<compile_context>
chip_gen: v6e
topology: v6e:2x2x1
jax: 0.10.0
libtpu: 0.0.40
codegen_flags: <defaults>
</compile_context>

<pallas_src>
import functools

import jax
import jax.numpy as jnp
from jax.experimental import pallas as pl
from jax.experimental.pallas import tpu as pltpu

_EPS = 1e-07
_LANES = 128
_SUBLANES = 8
_SUB_ROWS = 1024            # compute sub-tile (rows) inside one DMA block
_MAX_BLOCK_ROWS = 8192      # DMA block: (8192, 128) f32 = 4 MiB per input


def _wbce_kernel(pred_ref, tgt_ref, out_ref, *, blocks_per_core, num_blocks,
                 block_rows, rem_last, has_overhang):
    """Accumulate per-lane partial sums for one (block_rows, 128) block.

    out_ref: (1, 2, 8, 128) f32, resident across the inner (reduction) grid
    axis.  Channel 0 accumulates sum(t * log(p)); channel 1 accumulates
    sum((1 - t) * log(1 - p)).  pos_weight / final scaling happen in the
    wrapper so they are never baked into the kernel.
    """
    c = pl.program_id(0)
    i = pl.program_id(1)
    blk = c * blocks_per_core + i          # logical block index
    last = num_blocks - 1
    full_cap = block_rows * _LANES

    @pl.when(i == 0)
    def _init():
        out_ref[...] = jnp.zeros_like(out_ref)

    def _accumulate(masked):
        # Static sub-tiling: big DMA blocks, but <= (1024, 128) compute
        # working set per step, so temporaries never pressure VMEM/vregs.
        for start in range(0, block_rows, _SUB_ROWS):
            size = min(_SUB_ROWS, block_rows - start)
            lo = start * _LANES
            hi = (start + size) * _LANES
            if masked and lo >= rem_last:
                continue                            # sub-tile is pure padding
            need_mask = masked and hi > rem_last    # static decision

            p = pred_ref[start:start + size, :].astype(jnp.float32)
            t = tgt_ref[start:start + size, :].astype(jnp.float32)
            p = jnp.clip(p, _EPS, 1.0 - _EPS)
            term_pos = t * jnp.log(p)
            term_neg = (1.0 - t) * jnp.log(1.0 - p)

            if need_mask:
                # rem_last is a *static per-block* remaining count, so the
                # within-block index stays comfortably inside int32 no matter
                # how large the full tensor is.
                row = jax.lax.broadcasted_iota(jnp.int32, (size, _LANES), 0)
                lane = jax.lax.broadcasted_iota(jnp.int32, (size, _LANES), 1)
                valid = (lo + row * _LANES + lane) < rem_last
                term_pos = jnp.where(valid, term_pos, 0.0)
                term_neg = jnp.where(valid, term_neg, 0.0)

            # (size, 128) -> (8, 128) partials: (8,128)-tile aligned reshape,
            # lowers to plain VPU vreg adds (no cross-lane reduce).
            g = size // _SUBLANES
            out_ref[0, 0] += term_pos.reshape(g, _SUBLANES, _LANES).sum(axis=0)
            out_ref[0, 1] += term_neg.reshape(g, _SUBLANES, _LANES).sum(axis=0)

    if rem_last == full_cap:
        # Every in-range block is full: unmasked fast path everywhere.
        if has_overhang:
            @pl.when(blk <= last)
            def _run():
                _accumulate(False)
        else:
            _accumulate(False)
    else:
        # Only the final block pays for the tail mask; overhanging (clamped)
        # blocks on a 2-core split contribute nothing.
        @pl.when(blk < last)
        def _run_full():
            _accumulate(False)

        @pl.when(blk == last)
        def _run_tail():
            _accumulate(True)


def _num_tensorcores():
    """Best-effort TensorCores-per-chip detection (2 on v7x, else 1)."""
    try:
        kind = jax.devices()[0].device_kind.lower()
    except Exception:
        return 1
    return 2 if "v7" in kind else 1


def weighted_cross_entropy_loss(pred, target, pos_weight, *, num_cores=None):
    """Pallas TPU forward of WeightedCrossEntropyLoss.

    pred, target: (B, C, H, W).  Any float/int dtype is accepted and upcast
    to f32 in-register inside the kernel (pass bf16 pred / narrow targets
    straight through to cut HBM traffic; do not cast in the caller).
    Returns a scalar float32 loss matching the PyTorch module.
    """
    assert pred.shape == target.shape and pred.ndim == 4
    b, ch, h, w = pred.shape
    total_pixel = ch * h * w
    n = b * total_pixel

    if num_cores is None:
        num_cores = _num_tensorcores()
    num_cores = max(1, int(num_cores))

    # ---- Lane-dense 2-D view (avoid whole-array copies wherever possible).
    chunk = _SUBLANES * _LANES                      # 1024
    rows_raw = -(-n // _LANES)                      # ceil(n / 128)
    lane_aligned = (n % _LANES == 0)
    big = rows_raw >= _MAX_BLOCK_ROWS

    if lane_aligned and (big or rows_raw % _SUBLANES == 0):
        # Free path: contiguous NCHW reshapes to (rows, 128) as a bitcast --
        # no pad, no copy.  Large arrays tolerate a ragged final row-block
        # (masked in-kernel); small ones have rows % 8 == 0 so the single
        # full-array block is a legal tile.
        rows = rows_raw
        pred2 = pred.reshape(rows, _LANES)
        tgt2 = target.reshape(rows, _LANES)
    else:
        # Copy path: pad the flat view up to a whole (8,128) chunk.  Taken
        # only for lane-misaligned n or tiny (< ~4 MiB) arrays where the
        # extra traffic is negligible.
        # TODO(synk): a *large* lane-misaligned n still pays one pad copy.
        n_pad = -(-n // chunk) * chunk
        pad = n_pad - n
        pred2 = jnp.pad(pred.reshape(-1), (0, pad)).reshape(-1, _LANES)
        tgt2 = jnp.pad(target.reshape(-1), (0, pad)).reshape(-1, _LANES)
        rows = n_pad // _LANES

    # ---- Tiling: block_rows is always a multiple of 8 and <= rows.
    block_rows = min(_MAX_BLOCK_ROWS, rows)
    num_blocks = pl.cdiv(rows, block_rows)
    blocks_per_core = pl.cdiv(num_blocks, num_cores)
    has_overhang = num_cores * blocks_per_core > num_blocks
    # Valid (unpadded) elements inside the final block -- a static Python int.
    rem_last = n - (num_blocks - 1) * block_rows * _LANES

    kernel = functools.partial(
        _wbce_kernel,
        blocks_per_core=blocks_per_core,
        num_blocks=num_blocks,
        block_rows=block_rows,
        rem_last=rem_last,
        has_overhang=has_overhang,
    )

    def in_index(c_idx, i_idx):
        blk = c_idx * blocks_per_core + i_idx
        # Clamp overhanging block indices (possible only when num_cores > 1);
        # the kernel skips their accumulation entirely.
        return (jnp.minimum(blk, num_blocks - 1), 0)

    in_spec = pl.BlockSpec((block_rows, _LANES), in_index)
    out_spec = pl.BlockSpec((1, 2, _SUBLANES, _LANES),
                            lambda c_idx, i_idx: (c_idx, 0, 0, 0))

    # Scoped-VMEM budget: 2 inputs x 2 pipeline buffers x one block each, plus
    # headroom for the <=1024-row compute sub-tile.  Explicitly raises v5e's
    # 16 MiB default and stays well under v7x's 64 MiB physical VMEM.
    itemsize = pred.dtype.itemsize + target.dtype.itemsize
    in_block_bytes = block_rows * _LANES * itemsize
    vmem_limit = int(min(max(2 * in_block_bytes + (8 << 20), 16 << 20),
                         48 << 20))

    if num_cores > 1:
        core_sem = getattr(pltpu, "CORE_PARALLEL", "parallel")
        dim_sem = (core_sem, "arbitrary")
    else:
        dim_sem = ("arbitrary", "arbitrary")

    out_bytes = num_cores * 2 * _SUBLANES * _LANES * 4
    cost = pl.CostEstimate(
        flops=int(8 * n),
        transcendentals=int(2 * n),
        bytes_accessed=int(pred.size) * pred.dtype.itemsize
        + int(target.size) * target.dtype.itemsize + out_bytes,
    )

    partials = pl.pallas_call(
        kernel,
        out_shape=jax.ShapeDtypeStruct((num_cores, 2, _SUBLANES, _LANES),
                                       jnp.float32),
        grid_spec=pltpu.PrefetchScalarGridSpec(
            num_scalar_prefetch=0,
            grid=(num_cores, blocks_per_core),
            in_specs=[in_spec, in_spec],
            out_specs=out_spec,
        ),
        compiler_params=pltpu.CompilerParams(
            dimension_semantics=dim_sem,
            vmem_limit_bytes=vmem_limit,
        ),
        cost_estimate=cost,
    )(pred2, tgt2)

    # Final tiny reduction + pos_weight combine + scaling (plain XLA over
    # num_cores*2*8*128 floats).
    sum_pos = jnp.sum(partials[:, 0])
    sum_neg = jnp.sum(partials[:, 1])
    scale = 1.0 / (float(total_pixel) * float(b))
    return -(pos_weight * sum_pos + sum_neg) * scale


def _reference(pred, target, pos_weight):
    """Plain-JAX reference mirroring the PyTorch forward exactly."""
    b = pred.shape[0]
    total_pixel = pred.shape[1] * pred.shape[2] * pred.shape[3]
    p = jnp.clip(pred.astype(jnp.float32), _EPS, 1.0 - _EPS)
    t = target.astype(jnp.float32)
    per_sample = -(1.0 / total_pixel) * jnp.sum(
        pos_weight * t * jnp.log(p) + (1.0 - t) * jnp.log(1.0 - p),
        axis=(1, 2, 3),
    )
    return jnp.sum(per_sample) / b


if __name__ == "__main__":
    key = jax.random.PRNGKey(0)
    k1, k2, k3, k4 = jax.random.split(key, 4)
    pos_weight = 2.0  # deterministic "parameter" from __init__

    # Test 1: aligned NCHW maps (fast path: no pad, no mask, no guards).
    B, C, H, W = 2, 4, 16, 16
    pred = jax.nn.sigmoid(jax.random.normal(k1, (B, C, H, W), jnp.float32))
    target = (jax.random.uniform(k2, (B, C, H, W)) > 0.5).astype(jnp.float32)
    loss = jax.block_until_ready(
        weighted_cross_entropy_loss(pred, target, pos_weight))
    ref = _reference(pred, target, pos_weight)
    assert jnp.allclose(loss, ref, rtol=1e-5, atol=1e-6), (loss, ref)

    # Test 2: lane-misaligned size (pad + gated in-kernel tail mask path).
    B2, C2, H2, W2 = 1, 3, 26, 26
    pred2 = jax.nn.sigmoid(jax.random.normal(k3, (B2, C2, H2, W2), jnp.float32))
    target2 = (jax.random.uniform(k4, (B2, C2, H2, W2)) > 0.5).astype(
        jnp.float32)
    loss2 = jax.block_until_ready(
        weighted_cross_entropy_loss(pred2, target2, pos_weight))
    ref2 = _reference(pred2, target2, pos_weight)
    assert jnp.allclose(loss2, ref2, rtol=1e-5, atol=1e-6), (loss2, ref2)

    print("KERNEL_OK")
</pallas_src>

<mosaic_0001>
module attributes {stable_mosaic.version = 11 : i64} {
  func.func @_wbce_kernel(%arg0: i32, %arg1: i32, %arg2: memref<16x128xf32, #tpu.memory_space<vmem>>, %arg3: memref<16x128xf32, #tpu.memory_space<vmem>>, %arg4: memref<1x2x8x128xf32, #tpu.memory_space<vmem>>) attributes {dimension_semantics = [#tpu.dimension_semantics<arbitrary>, #tpu.dimension_semantics<arbitrary>], iteration_bounds = array<i64: 1, 1>, scalar_prefetch = 0 : i64, scratch_operands = 0 : i64, tpu.core_type = #tpu.core_type<tc>, window_params = [{transform_indices = @transform_0, window_bounds = array<i64: 16, 128>}, {transform_indices = @transform_1, window_bounds = array<i64: 16, 128>}, {transform_indices = @transform_2, window_bounds = array<i64: 1, 2, 8, 128>}]} {
    %c0_i32 = arith.constant 0 : i32
    %0 = arith.cmpi eq, %arg1, %c0_i32 : i32
    %1 = arith.extui %0 : i1 to i32
    %c0_i32_0 = arith.constant 0 : i32
    %2 = arith.cmpi ne, %1, %c0_i32_0 : i32
    scf.if %2 {
      %cst_24 = arith.constant 0.000000e+00 : f32
      %33 = vector.broadcast %cst_24 : f32 to vector<1x2x8x128xf32>
      %c0_25 = arith.constant 0 : index
      %c0_26 = arith.constant 0 : index
      %c0_27 = arith.constant 0 : index
      %c0_28 = arith.constant 0 : index
      %34 = vector.load %arg4[%c0_25, %c0_26, %c0_27, %c0_28] : memref<1x2x8x128xf32, #tpu.memory_space<vmem>>, vector<1x2x8x128xf32>
      tpu.vector_store %arg4[%c0_25, %c0_26, %c0_27, %c0_28], %33 {strides = array<i32>} : memref<1x2x8x128xf32, #tpu.memory_space<vmem>>, vector<1x2x8x128xf32>,
    } else {
    }
    %c0 = arith.constant 0 : index
    %c0_1 = arith.constant 0 : index
    %3 = vector.load %arg2[%c0, %c0_1] : memref<16x128xf32, #tpu.memory_space<vmem>>, vector<16x128xf32>
    %c0_2 = arith.constant 0 : index
    %c0_3 = arith.constant 0 : index
    %4 = vector.load %arg3[%c0_2, %c0_3] : memref<16x128xf32, #tpu.memory_space<vmem>>, vector<16x128xf32>
    %cst = arith.constant 1.000000e-07 : f32
    %cst_4 = arith.constant 0.99999988 : f32
    %5 = vector.broadcast %cst : f32 to vector<16x128xf32>
    %6 = arith.maximumf %5, %3 : vector<16x128xf32>
    %7 = vector.broadcast %cst_4 : f32 to vector<16x128xf32>
    %8 = arith.minimumf %7, %6 : vector<16x128xf32>
    %9 = math.log %8 : vector<16x128xf32>
    %10 = arith.mulf %4, %9 : vector<16x128xf32>
    %cst_5 = arith.constant 1.000000e+00 : f32
    %11 = vector.broadcast %cst_5 : f32 to vector<16x128xf32>
    %12 = arith.subf %11, %4 : vector<16x128xf32>
    %cst_6 = arith.constant 1.000000e+00 : f32
    %13 = vector.broadcast %cst_6 : f32 to vector<16x128xf32>
    %14 = arith.subf %13, %8 : vector<16x128xf32>
    %15 = math.log %14 : vector<16x128xf32>
    %16 = arith.mulf %12, %15 : vector<16x128xf32>
    %c0_7 = arith.constant 0 : index
    %c0_8 = arith.constant 0 : index
    %c0_9 = arith.constant 0 : index
    %c0_10 = arith.constant 0 : index
    %17 = vector.load %arg4[%c0_7, %c0_8, %c0_9, %c0_10] : memref<1x2x8x128xf32, #tpu.memory_space<vmem>>, vector<1x1x8x128xf32>
    %18 = vector.shape_cast %17 : vector<1x1x8x128xf32> to vector<8x128xf32>
    %19 = vector.shape_cast %10 : vector<16x128xf32> to vector<2x8x128xf32>
    %cst_11 = arith.constant dense<0.000000e+00> : vector<8x128xf32>
    %20 = vector.multi_reduction <add>, %19, %cst_11 [0] : vector<2x8x128xf32> to vector<8x128xf32>
    %21 = arith.addf %18, %20 : vector<8x128xf32>
    %c0_12 = arith.constant 0 : index
    %c0_13 = arith.constant 0 : index
    %c0_14 = arith.constant 0 : index
    %c0_15 = arith.constant 0 : index
    %22 = vector.load %arg4[%c0_12, %c0_13, %c0_14, %c0_15] : memref<1x2x8x128xf32, #tpu.memory_space<vmem>>, vector<1x1x8x128xf32>
    %23 = vector.shape_cast %22 : vector<1x1x8x128xf32> to vector<8x128xf32>
    %24 = vector.shape_cast %21 : vector<8x128xf32> to vector<1x1x8x128xf32>
    tpu.vector_store %arg4[%c0_12, %c0_13, %c0_14, %c0_15], %24 {strides = array<i32>} : memref<1x2x8x128xf32, #tpu.memory_space<vmem>>, vector<1x1x8x128xf32>,
    %c0_16 = arith.constant 0 : index
    %c1 = arith.constant 1 : index
    %c0_17 = arith.constant 0 : index
    %c0_18 = arith.constant 0 : index
    %25 = vector.load %arg4[%c0_16, %c1, %c0_17, %c0_18] : memref<1x2x8x128xf32, #tpu.memory_space<vmem>>, vector<1x1x8x128xf32>
    %26 = vector.shape_cast %25 : vector<1x1x8x128xf32> to vector<8x128xf32>
    %27 = vector.shape_cast %16 : vector<16x128xf32> to vector<2x8x128xf32>
    %cst_19 = arith.constant dense<0.000000e+00> : vector<8x128xf32>
    %28 = vector.multi_reduction <add>, %27, %cst_19 [0] : vector<2x8x128xf32> to vector<8x128xf32>
    %29 = arith.addf %26, %28 : vector<8x128xf32>
    %c0_20 = arith.constant 0 : index
    %c1_21 = arith.constant 1 : index
    %c0_22 = arith.constant 0 : index
    %c0_23 = arith.constant 0 : index
    %30 = vector.load %arg4[%c0_20, %c1_21, %c0_22, %c0_23] : memref<1x2x8x128xf32, #tpu.memory_space<vmem>>, vector<1x1x8x128xf32>
    %31 = vector.shape_cast %30 : vector<1x1x8x128xf32> to vector<8x128xf32>
    %32 = vector.shape_cast %29 : vector<8x128xf32> to vector<1x1x8x128xf32>
    tpu.vector_store %arg4[%c0_20, %c1_21, %c0_22, %c0_23], %32 {strides = array<i32>} : memref<1x2x8x128xf32, #tpu.memory_space<vmem>>, vector<1x1x8x128xf32>,
    return
  }
  func.func @transform_0(%arg0: i32, %arg1: i32) -> (i32, i32) {
    %c1_i32 = arith.constant 1 : i32
    %0 = arith.muli %arg0, %c1_i32 : i32
    %1 = arith.addi %0, %arg1 : i32
    %c0_i32 = arith.constant 0 : i32
    %2 = arith.minsi %1, %c0_i32 : i32
    %c0_i32_0 = arith.constant 0 : i32
    %c0_i32_1 = arith.constant 0 : i32
    return %2, %c0_i32_0 : i32, i32
  }
  func.func @transform_1(%arg0: i32, %arg1: i32) -> (i32, i32) {
    %c1_i32 = arith.constant 1 : i32
    %0 = arith.muli %arg0, %c1_i32 : i32
    %1 = arith.addi %0, %arg1 : i32
    %c0_i32 = arith.constant 0 : i32
    %2 = arith.minsi %1, %c0_i32 : i32
    %c0_i32_0 = arith.constant 0 : i32
    %c0_i32_1 = arith.constant 0 : i32
    return %2, %c0_i32_0 : i32, i32
  }
  func.func @transform_2(%arg0: i32, %arg1: i32) -> (i32, i32, i32, i32) {
    %c0_i32 = arith.constant 0 : i32
    %c0_i32_0 = arith.constant 0 : i32
    %c0_i32_1 = arith.constant 0 : i32
    %c0_i32_2 = arith.constant 0 : i32
    return %arg0, %c0_i32, %c0_i32_0, %c0_i32_1 : i32, i32, i32, i32
  }
}

</mosaic_0001>

<bundles_post_ra>
// kernel: tpu_custom_call.1
= control target key start
LH: loop header
LB: loop body
LE: loop exit
PB: predicated region body
PF: predicated region fallthrough
CT: control target
= control target key end

     0   :  { %7 = vsyncpa [#allocation3], 0  ;;  %s239_s0 = inlined_call_operand.hbm [shape: f32[16,128], index: 0, kind: input, shape index: {}]   ;;  %s240_s1 = inlined_call_operand.hbm [shape: f32[16,128], index: 1, kind: input, shape index: {}]   ;;  %s241_s2 = inlined_call_operand.hbm [shape: f32[1,2,8,128], index: 2, kind: output, shape index: {}]  }
   0x1   :  { %8 = vsyncpa [#allocation6], 0 }
   0x2   :  { %9 = vsyncpa [#allocation4], 0  ;;  %s201_s9 = smov [#allocation2]  }
   0x3   :  { %s21_s10 = sshll.u32 %s201_s9, 4  ;;  %s22_s10 = int_to_ptr.vmem [resolvable:$true] %s21_s10 }
   0x4   :  { %s143_s11 = scalar_lea.vmem %s22_s10, 256  ;;  %p148_p1 = scmp.lt.s32.totalorder %s22_s10, %s22_s10 }
   0x5   :  { %p144_p0 = scmp.ne.s32.totalorder %s22_s10, %s143_s11  ;;  %p149_p2 = scmp.lt.s32.totalorder %s143_s11, %s143_s11 }
   0x7   :  { %p150_p3 = por %p149_p2, %p148_p1 }
   0x9   :  { %p151_p4 = pnand %p150_p3, %p144_p0 }
   0xb   :  { %154 = shalt.err (!%p151_p4)
}
   0xc   :  { %s202_s12 = smov 128   ;;  %s203_s13 = smov 8  }
   0xd   :  { %27 = dma.hbm_to_vmem [thread:$0]  %s239_s0, 256, %s22_s10, [#allocation3], %s202_s12, %s202_s12, %s203_s13  }
   0xe   :  { %s204_s16 = smov [#allocation5]  }
   0xf   :  { %s39_s17 = sshll.u32 %s204_s16, 4  ;;  %s40_s17 = int_to_ptr.vmem [resolvable:$true] %s39_s17 }
  0x10   :  { %s163_s18 = scalar_lea.vmem %s40_s17, 256  ;;  %p168_p6 = scmp.lt.s32.totalorder %s40_s17, %s40_s17 }
  0x11   :  { %p164_p5 = scmp.ne.s32.totalorder %s40_s17, %s163_s18  ;;  %p169_p7 = scmp.lt.s32.totalorder %s163_s18, %s163_s18 }
  0x13   :  { %p170_p8 = por %p169_p7, %p168_p6 }
  0x15   :  { %p171_p9 = pnand %p170_p8, %p164_p5 }
  0x17   :  { %174 = shalt.err (!%p171_p9)
}
  0x18   :  { %45 = dma.hbm_to_vmem [thread:$0]  %s240_s1, 256, %s40_s17, [#allocation6], %s202_s12, %s202_s12, %s203_s13  }
  0x19   :  { %195 = dma.done.wait [#allocation3], 256  }
  0x1a   :  { %196 = vsyncadd [#allocation3], 4294967040 }
  0x1b   :  { %197 = dma.done.wait [#allocation6], 256  }
  0x1c   :  { %198 = vsyncadd [#allocation6], 4294967040  ;;  %v66_v0 = vld [vmem:[#allocation2] sm:$0xff]  ;;  %v67_v1 = vld [vmem:[#allocation2 + $0x8] sm:$0xff]  ;;  %s205_s0 = smov [#allocation7]  }
  0x1d   :  { %v70_v2 = vmax.f32 %v66_v0, 1e-07  ;;  %v71_v3 = vmax.f32 %v67_v1, 1e-07  ;;  %v68_v8 = vld [vmem:[#allocation5] sm:$0xff]  ;;  %v69_v9 = vld [vmem:[#allocation5 + $0x8] sm:$0xff] }
  0x1e   :  { %v80_v13 = vsub.f32 1.0, %v68_v8  ;;  %v81_v16 = vsub.f32 1.0, %v69_v9  ;;  %s104_s1 = sshll.u32 %s205_s0, 4  ;;  %s105_s1 = int_to_ptr.vmem [resolvable:$true] %s104_s1 }
  0x1f   :  { %v72_v4 = vmin.f32 %v70_v2, 0.9999999  ;;  %v73_v5 = vmin.f32 %v71_v3, 0.9999999  ;;  %s175_s21 = scalar_lea.vmem %s105_s1, 256  ;;  %p180_p11 = scmp.lt.s32.totalorder %s105_s1, %s105_s1 }
  0x20   :  { %p176_p10 = scmp.ne.s32.totalorder %s105_s1, %s175_s21  ;;  %p181_p12 = scmp.lt.s32.totalorder %s175_s21, %s175_s21 }
  0x21   :  { %127 = vlog2.f32 %v72_v4  ;;  %v82_v6 = vsub.f32 1.0, %v72_v4  ;;  %v83_v7 = vsub.f32 1.0, %v73_v5 }
  0x22   :  { %129 = vlog2.f32 %v73_v5  ;;  %p182_p13 = por %p181_p12, %p180_p11 }
  0x23   :  { %131 = vlog2.f32 %v82_v6 }
  0x24   :  { %133 = vlog2.f32 %v83_v7  ;;  %p183_p0 = pnand %p182_p13, %p176_p10 }
  0x2e   :  { %v128_v10 = vpop.eup %127 }
  0x2f   :  { %v130_v11 = vpop.eup %129  ;;  %v75_v12 = vmul.f32 0.6931472, %v128_v10 }
  0x30   :  { %v132_v14 = vpop.eup %131  ;;  %v77_v15 = vmul.f32 0.6931472, %v130_v11 }
  0x31   :  { %v134_v17 = vpop.eup %133  ;;  %v78_v18 = vmul.f32 %v75_v12, %v68_v8  ;;  %v85_v19 = vmul.f32 0.6931472, %v132_v14 }
  0x32   :  { %v79_v20 = vmul.f32 %v77_v15, %v69_v9  ;;  %v87_v21 = vmul.f32 0.6931472, %v134_v17 }
  0x33   :  { %v88_v22 = vmul.f32 %v85_v19, %v80_v13 }
  0x34   :  { %v91_v23 = vadd.f32 %v79_v20, %v78_v18  ;;  %v89_v24 = vmul.f32 %v87_v21, %v81_v16 }
  0x36   :  { %v96_v25 = vadd.f32 %v89_v24, %v88_v22  ;;  %93 = vst [vmem:[#allocation7] sm:$0xff] %v91_v23 }
  0x38   :  { %98 = vst [vmem:[#allocation7 + $0x8] sm:$0xff] %v96_v25 }
  0x39   :  { %186 = shalt.err (!%p183_p0)
}
  0x3a   :  { %110 = dma.vmem_to_hbm [thread:$0]  %s105_s1, 256, %s241_s2, [#allocation4], %s202_s12, %s202_s12, %s203_s13  }
  0x3b   :  { %199 = dma.done.wait [#allocation4], 256  }
  0x3c   :  { %200 = vsyncadd [#allocation4], 4294967040 }
  0x3d   :  { %114 = vsyncpa [#allocation3], 1 }
  0x3e   :  { %115 = vsyncpa [#allocation6], 1 }
  0x3f   :  { %116 = vsyncpa [#allocation4], 1 }

</bundles_post_ra>
